<compile_context>
chip_gen: v6e
topology: v6e:2x2x1
jax: 0.10.0
libtpu: 0.0.40
codegen_flags: <defaults>
</compile_context>

<pallas_src>
import functools

import jax
import jax.numpy as jnp
from jax.experimental import pallas as pl
from jax.experimental.pallas import tpu as pltpu

_LANE = 128
_MAX_BLOCK_ROWS = 1024           # (1024, 128) f32 block = 512 KiB
_NUM_CORES = 2                   # v7x megacore; harmless on v5e/v6e (1 TC)
_FUSE_BYTES = 4 * 1024 * 1024    # dynamic path: fuse when slab <= 4 MiB
_VMEM_LIMIT = 32 * 1024 * 1024   # > v5e's 16 MiB default, within v7x budget


# ---------------------------------------------------------------------------
# Pallas kernels
# ---------------------------------------------------------------------------
def _minmax_kernel(x_ref, min_ref, max_ref, acc_min, acc_max, *,
                   block_rows, blocks_per_core, valid_rows):
    """Per-core partial min/max via a block-shaped VMEM accumulator."""
    c = pl.program_id(0)          # core-split axis ("parallel")
    i = pl.program_id(1)          # reduction axis ("arbitrary")

    @pl.when(i == 0)
    def _init():
        acc_min[...] = jnp.full(acc_min.shape, jnp.inf, jnp.float32)
        acc_max[...] = jnp.full(acc_max.shape, -jnp.inf, jnp.float32)

    blk = x_ref[...]
    blk_start = (c * blocks_per_core + i) * block_rows
    is_full = blk_start + block_rows <= valid_rows

    @pl.when(is_full)
    def _full_block():               # steady state: 1 vmin + 1 vmax per vreg
        acc_min[...] = jnp.minimum(acc_min[...], blk)
        acc_max[...] = jnp.maximum(acc_max[...], blk)

    @pl.when(jnp.logical_not(is_full))
    def _partial_block():            # last (or clamped duplicate) block only
        row = blk_start + jax.lax.broadcasted_iota(jnp.int32, blk.shape, 0)
        valid = row < valid_rows
        acc_min[...] = jnp.minimum(acc_min[...],
                                   jnp.where(valid, blk, jnp.inf))
        acc_max[...] = jnp.maximum(acc_max[...],
                                   jnp.where(valid, blk, -jnp.inf))

    @pl.when(i == pl.num_programs(1) - 1)
    def _epilogue():                 # single cross-lane reduce per core
        min_ref[...] = jnp.full(min_ref.shape, jnp.min(acc_min[...]),
                                jnp.float32)
        max_ref[...] = jnp.full(max_ref.shape, jnp.max(acc_max[...]),
                                jnp.float32)


def _fakequant_kernel(params_ref, x_ref, o_ref):
    """Elementwise fake quantization: s*round((clip(x,lb,ub)-lb)*inv_s)+lb."""
    lb = params_ref[0]
    ub = params_ref[1]
    s = params_ref[2]
    inv_s = params_ref[3]
    c = jnp.clip(x_ref[...], lb, ub)          # Differentiable_Clip.forward
    r = jnp.round((c - lb) * inv_s)           # Differentiable_Round.forward
    o_ref[...] = s * r + lb


def _dynamic_fused_kernel(nbit_ref, x_ref, o_ref):
    """Fused dynamic path: min/max + fake quantization with data in VMEM."""
    blk = x_ref[...]
    lb = jnp.min(blk)
    ub = jnp.max(blk)
    s = (ub - lb) / nbit_ref[0]
    inv_s = 1.0 / s
    c = jnp.clip(blk, lb, ub)
    o_ref[...] = s * jnp.round((c - lb) * inv_s) + lb


# ---------------------------------------------------------------------------
# Slab helpers (plain JAX). Copies only happen when numel % 128 != 0.
# ---------------------------------------------------------------------------
def _to_slab(x):
    flat = x.reshape(-1).astype(jnp.float32)
    n = flat.shape[0]
    pad = (-n) % _LANE
    if pad:
        # edge padding keeps global min/max unchanged; padded outputs are
        # sliced off again in _from_slab.
        flat = jnp.pad(flat, (0, pad), mode="edge")
    return flat.reshape(-1, _LANE), n, pad


def _from_slab(slab_out, shape, n, pad):
    if pad:
        return slab_out.reshape(-1)[:n].reshape(shape)
    return slab_out.reshape(shape)


def _pick_block_rows(rows, max_block_rows):
    # full-dim block when it fits (no (8,128) constraint issues), else a
    # multiple-of-8 row tile with Pallas handling the partial last block.
    return rows if rows <= max_block_rows else max_block_rows


# ---------------------------------------------------------------------------
# pallas_call wrappers
# ---------------------------------------------------------------------------
@functools.partial(jax.jit, static_argnames=("max_block_rows",))
def pallas_minmax(x, max_block_rows=_MAX_BLOCK_ROWS):
    slab, _, _ = _to_slab(x)
    rows = slab.shape[0]
    block_rows = _pick_block_rows(rows, max_block_rows)
    nblocks = pl.cdiv(rows, block_rows)
    nsplit = min(_NUM_CORES, nblocks)
    bpc = pl.cdiv(nblocks, nsplit)

    kernel = functools.partial(_minmax_kernel, block_rows=block_rows,
                               blocks_per_core=bpc, valid_rows=rows)
    # Clamp the block index; any duplicated/overshooting block is fully
    # masked inside the kernel via valid_rows.
    in_map = lambda c, i: (jnp.minimum(c * bpc + i, nblocks - 1), 0)

    mn, mx = pl.pallas_call(
        kernel,
        out_shape=(jax.ShapeDtypeStruct((nsplit * 8, _LANE), jnp.float32),
                   jax.ShapeDtypeStruct((nsplit * 8, _LANE), jnp.float32)),
        grid=(nsplit, bpc),
        in_specs=[pl.BlockSpec((block_rows, _LANE), in_map)],
        out_specs=(pl.BlockSpec((8, _LANE), lambda c, i: (c, 0)),
                   pl.BlockSpec((8, _LANE), lambda c, i: (c, 0))),
        scratch_shapes=[pltpu.VMEM((block_rows, _LANE), jnp.float32),
                        pltpu.VMEM((block_rows, _LANE), jnp.float32)],
        compiler_params=pltpu.CompilerParams(
            dimension_semantics=("parallel", "arbitrary"),
            vmem_limit_bytes=_VMEM_LIMIT),
    )(slab)
    # Combine per-core partials (identity values +inf/-inf make this safe).
    return jnp.min(mn), jnp.max(mx)


@functools.partial(jax.jit, static_argnames=("max_block_rows",))
def pallas_fake_quant(x, lb, ub, n_bit, max_block_rows=_MAX_BLOCK_ROWS):
    slab, n, pad = _to_slab(x)
    rows = slab.shape[0]
    block_rows = _pick_block_rows(rows, max_block_rows)
    grid = (pl.cdiv(rows, block_rows),)

    lb = jnp.asarray(lb, jnp.float32).reshape(())
    ub = jnp.asarray(ub, jnp.float32).reshape(())
    nb = jnp.asarray(n_bit, jnp.float32).reshape(())
    s = (ub - lb) / nb
    inv_s = 1.0 / s                      # scalar: divide -> per-element mul
    params = jnp.stack([lb, ub, s, inv_s])

    out = pl.pallas_call(
        _fakequant_kernel,
        out_shape=jax.ShapeDtypeStruct(slab.shape, jnp.float32),
        grid=grid,
        in_specs=[
            pl.BlockSpec(memory_space=pltpu.MemorySpace.SMEM),
            pl.BlockSpec((block_rows, _LANE), lambda i: (i, 0)),
        ],
        out_specs=pl.BlockSpec((block_rows, _LANE), lambda i: (i, 0)),
        compiler_params=pltpu.CompilerParams(
            dimension_semantics=("parallel",),
            vmem_limit_bytes=_VMEM_LIMIT),
    )(params, slab)
    return _from_slab(out, x.shape, n, pad).astype(x.dtype)


@jax.jit
def _pallas_dynamic_fused(x, n_bit):
    slab, n, pad = _to_slab(x)
    rows = slab.shape[0]
    nb = jnp.asarray(n_bit, jnp.float32).reshape((1,))
    out = pl.pallas_call(
        _dynamic_fused_kernel,
        out_shape=jax.ShapeDtypeStruct(slab.shape, jnp.float32),
        grid=(1,),
        in_specs=[
            pl.BlockSpec(memory_space=pltpu.MemorySpace.SMEM),
            pl.BlockSpec((rows, _LANE), lambda i: (0, 0)),
        ],
        out_specs=pl.BlockSpec((rows, _LANE), lambda i: (0, 0)),
        compiler_params=pltpu.CompilerParams(
            dimension_semantics=("arbitrary",),
            vmem_limit_bytes=_VMEM_LIMIT),
    )(nb, slab)
    return _from_slab(out, x.shape, n, pad).astype(x.dtype)


def pallas_dynamic_fake_quant(x, n_bit):
    # Fuse min/max + quantize when the whole slab fits comfortably in VMEM
    # (single HBM read), otherwise fall back to the two-pass pipeline.
    if x.size * 4 <= _FUSE_BYTES:
        return _pallas_dynamic_fused(x, n_bit)
    lb, ub = pallas_minmax(x)
    return pallas_fake_quant(x, lb, ub, jnp.reshape(n_bit, ()))


# ---------------------------------------------------------------------------
# Module re-implementation (stateful Python wrapper around the kernels)
# ---------------------------------------------------------------------------
class FakeQuantizerActParam2:
    def __init__(self, key, bit=4, int_quant=True):
        k1, k2 = jax.random.split(key)
        # Parameters: randn((1,)) bounds; n_bit set manually to `bit`.
        self.lower_bound = jax.random.normal(k1, (1,), jnp.float32)
        self.upper_bound = jax.random.normal(k2, (1,), jnp.float32)
        self.n_bit = jnp.asarray([float(bit)], jnp.float32)
        self.int_quant = int_quant
        self.running_stat = True
        self.first_iter = True
        self.dynamic = False
        self.beta = 0.995

    def __call__(self, x):
        if self.dynamic:
            return pallas_dynamic_fake_quant(x, self.n_bit)
        if self.running_stat:
            lb, ub = pallas_minmax(x)
            if self.first_iter:
                self.lower_bound = lb.reshape(1)
                self.upper_bound = ub.reshape(1)
                self.first_iter = False
            else:
                self.lower_bound = (self.beta * self.lower_bound
                                    + (1.0 - self.beta) * lb)
                self.upper_bound = (self.beta * self.upper_bound
                                    + (1.0 - self.beta) * ub)
            return x
        # TODO(synk): the reference PyTorch forward uses an undefined `n_bits`
        # here (latent bug); we use self.n_bit, matching the intended semantics.
        return pallas_fake_quant(x, self.lower_bound[0], self.upper_bound[0],
                                 self.n_bit[0])


# ---------------------------------------------------------------------------
if __name__ == "__main__":
    key = jax.random.PRNGKey(0)
    kx, kp = jax.random.split(key)
    x = jax.random.normal(kx, (2, 4, 16, 16), jnp.float32)  # NCHW

    q = FakeQuantizerActParam2(kp)

    # 1) running_stat + first_iter -> min/max kernel, identity output.
    y1 = q(x)
    jax.block_until_ready(y1)
    assert jnp.allclose(y1, x)
    assert jnp.allclose(q.lower_bound[0], jnp.min(x), atol=1e-6)
    assert jnp.allclose(q.upper_bound[0], jnp.max(x), atol=1e-6)

    # 2) second call: moving-average update of the bounds, identity output.
    y2 = q(1.5 * x)
    jax.block_until_ready(y2)
    lb_ref = 0.995 * jnp.min(x) + (1.0 - 0.995) * jnp.min(1.5 * x)
    ub_ref = 0.995 * jnp.max(x) + (1.0 - 0.995) * jnp.max(1.5 * x)
    assert jnp.allclose(q.lower_bound[0], lb_ref, atol=1e-5)
    assert jnp.allclose(q.upper_bound[0], ub_ref, atol=1e-5)

    # 3) static quantization path (running_stat disabled) -> fake-quant kernel.
    q.running_stat = False
    y3 = q(x)
    jax.block_until_ready(y3)
    lb, ub, nb = q.lower_bound[0], q.upper_bound[0], q.n_bit[0]
    s = (ub - lb) / nb
    ref3 = s * jnp.round((jnp.clip(x, lb, ub) - lb) * (1.0 / s)) + lb
    assert jnp.allclose(y3, ref3, atol=1e-5), "fake-quant mismatch"

    # 4) dynamic path -> fused min/max + quantize kernel.
    q.dynamic = True
    y4 = q(x)
    jax.block_until_ready(y4)
    dlb, dub = jnp.min(x), jnp.max(x)
    ds = (dub - dlb) / nb
    ref4 = ds * jnp.round((jnp.clip(x, dlb, dub) - dlb) * (1.0 / ds)) + dlb
    assert jnp.allclose(y4, ref4, atol=1e-5), "dynamic fake-quant mismatch"

    # 5) odd-sized input: exercises the (rare) pad/slice path.
    x_odd = jax.random.normal(jax.random.PRNGKey(1), (1, 3, 17, 19),
                              jnp.float32)
    mn, mx = pallas_minmax(x_odd)
    assert jnp.allclose(mn, jnp.min(x_odd), atol=1e-6)
    assert jnp.allclose(mx, jnp.max(x_odd), atol=1e-6)
    y5 = pallas_fake_quant(x_odd, mn, mx, nb)
    s5 = (mx - mn) / nb
    ref5 = s5 * jnp.round((jnp.clip(x_odd, mn, mx) - mn) * (1.0 / s5)) + mn
    assert jnp.allclose(y5, ref5, atol=1e-5), "odd-size fake-quant mismatch"

    # 6) multi-block grid with a partial last block + clamped/masked blocks
    #    (small block cap to exercise the big-tensor code paths at tiny size).
    x_multi = jax.random.normal(jax.random.PRNGKey(2), (2, 4, 16, 19),
                                jnp.float32)  # 2432 elems -> 19 rows of 128
    mn2, mx2 = pallas_minmax(x_multi, max_block_rows=8)
    assert jnp.allclose(mn2, jnp.min(x_multi), atol=1e-6)
    assert jnp.allclose(mx2, jnp.max(x_multi), atol=1e-6)
    y6 = pallas_fake_quant(x_multi, mn2, mx2, nb, max_block_rows=8)
    s6 = (mx2 - mn2) / nb
    ref6 = (s6 * jnp.round((jnp.clip(x_multi, mn2, mx2) - mn2) * (1.0 / s6))
            + mn2)
    assert jnp.allclose(y6, ref6, atol=1e-5), "multi-block fake-quant mismatch"

    print("KERNEL_OK")
</pallas_src>

<mosaic_0001>
module attributes {stable_mosaic.version = 11 : i64} {
  func.func @_minmax_kernel(%arg0: i32, %arg1: i32, %arg2: memref<16x128xf32, #tpu.memory_space<vmem>>, %arg3: memref<8x128xf32, #tpu.memory_space<vmem>>, %arg4: memref<8x128xf32, #tpu.memory_space<vmem>>, %arg5: memref<16x128xf32, #tpu.memory_space<vmem>>, %arg6: memref<16x128xf32, #tpu.memory_space<vmem>>) attributes {dimension_semantics = [#tpu.dimension_semantics<parallel>, #tpu.dimension_semantics<arbitrary>], iteration_bounds = array<i64: 1, 1>, scalar_prefetch = 0 : i64, scratch_operands = 2 : i64, tpu.core_type = #tpu.core_type<tc>, window_params = [{transform_indices = @transform_0, window_bounds = array<i64: 16, 128>}, {transform_indices = @transform_1, window_bounds = array<i64: 8, 128>}, {transform_indices = @transform_2, window_bounds = array<i64: 8, 128>}]} {
    %c0_i32 = arith.constant 0 : i32
    %0 = arith.cmpi eq, %arg1, %c0_i32 : i32
    %1 = arith.extui %0 : i1 to i32
    %c0_i32_0 = arith.constant 0 : i32
    %2 = arith.cmpi ne, %1, %c0_i32_0 : i32
    scf.if %2 {
      %cst = arith.constant 0x7F800000 : f32
      %17 = vector.broadcast %cst : f32 to vector<16x128xf32>
      %c0_8 = arith.constant 0 : index
      %c0_9 = arith.constant 0 : index
      %18 = vector.load %arg5[%c0_8, %c0_9] : memref<16x128xf32, #tpu.memory_space<vmem>>, vector<16x128xf32>
      tpu.vector_store %arg5[%c0_8, %c0_9], %17 {strides = array<i32>} : memref<16x128xf32, #tpu.memory_space<vmem>>, vector<16x128xf32>,
      %cst_10 = arith.constant 0xFF800000 : f32
      %19 = vector.broadcast %cst_10 : f32 to vector<16x128xf32>
      %c0_11 = arith.constant 0 : index
      %c0_12 = arith.constant 0 : index
      %20 = vector.load %arg6[%c0_11, %c0_12] : memref<16x128xf32, #tpu.memory_space<vmem>>, vector<16x128xf32>
      tpu.vector_store %arg6[%c0_11, %c0_12], %19 {strides = array<i32>} : memref<16x128xf32, #tpu.memory_space<vmem>>, vector<16x128xf32>,
    } else {
    }
    %c0 = arith.constant 0 : index
    %c0_1 = arith.constant 0 : index
    %3 = vector.load %arg2[%c0, %c0_1] : memref<16x128xf32, #tpu.memory_space<vmem>>, vector<16x128xf32>
    %c1_i32 = arith.constant 1 : i32
    %4 = arith.muli %arg0, %c1_i32 : i32
    %5 = arith.addi %4, %arg1 : i32
    %c16_i32 = arith.constant 16 : i32
    %6 = arith.muli %5, %c16_i32 : i32
    %c16_i32_2 = arith.constant 16 : i32
    %7 = arith.addi %6, %c16_i32_2 : i32
    %c16_i32_3 = arith.constant 16 : i32
    %8 = arith.cmpi sle, %7, %c16_i32_3 : i32
    %9 = arith.extui %8 : i1 to i32
    %c0_i32_4 = arith.constant 0 : i32
    %10 = arith.cmpi ne, %9, %c0_i32_4 : i32
    scf.if %10 {
      %c0_8 = arith.constant 0 : index
      %c0_9 = arith.constant 0 : index
      %17 = vector.load %arg5[%c0_8, %c0_9] : memref<16x128xf32, #tpu.memory_space<vmem>>, vector<16x128xf32>
      %18 = arith.minimumf %17, %3 : vector<16x128xf32>
      %c0_10 = arith.constant 0 : index
      %c0_11 = arith.constant 0 : index
      %19 = vector.load %arg5[%c0_10, %c0_11] : memref<16x128xf32, #tpu.memory_space<vmem>>, vector<16x128xf32>
      tpu.vector_store %arg5[%c0_10, %c0_11], %18 {strides = array<i32>} : memref<16x128xf32, #tpu.memory_space<vmem>>, vector<16x128xf32>,
      %c0_12 = arith.constant 0 : index
      %c0_13 = arith.constant 0 : index
      %20 = vector.load %arg6[%c0_12, %c0_13] : memref<16x128xf32, #tpu.memory_space<vmem>>, vector<16x128xf32>
      %21 = arith.maximumf %20, %3 : vector<16x128xf32>
      %c0_14 = arith.constant 0 : index
      %c0_15 = arith.constant 0 : index
      %22 = vector.load %arg6[%c0_14, %c0_15] : memref<16x128xf32, #tpu.memory_space<vmem>>, vector<16x128xf32>
      tpu.vector_store %arg6[%c0_14, %c0_15], %21 {strides = array<i32>} : memref<16x128xf32, #tpu.memory_space<vmem>>, vector<16x128xf32>,
    } else {
    }
    %true = arith.constant true
    %11 = arith.xori %8, %true : i1
    %12 = arith.extui %11 : i1 to i32
    %c0_i32_5 = arith.constant 0 : i32
    %13 = arith.cmpi ne, %12, %c0_i32_5 : i32
    scf.if %13 {
      %17 = tpu.iota {dimensions = array<i32: 0>} : vector<16x128xi32>
      %18 = vector.broadcast %6 : i32 to vector<16x128xi32>
      %19 = arith.addi %18, %17 : vector<16x128xi32>
      %c16_i32_8 = arith.constant 16 : i32
      %20 = vector.broadcast %c16_i32_8 : i32 to vector<16x128xi32>
      %21 = arith.cmpi slt, %19, %20 : vector<16x128xi32>
      %c0_9 = arith.constant 0 : index
      %c0_10 = arith.constant 0 : index
      %22 = vector.load %arg5[%c0_9, %c0_10] : memref<16x128xf32, #tpu.memory_space<vmem>>, vector<16x128xf32>
      %cst = arith.constant 0x7F800000 : f32
      %23 = vector.broadcast %cst : f32 to vector<16x128xf32>
      %24 = arith.select %21, %3, %23 : vector<16x128xi1>, vector<16x128xf32>
      %25 = arith.minimumf %22, %24 : vector<16x128xf32>
      %c0_11 = arith.constant 0 : index
      %c0_12 = arith.constant 0 : index
      %26 = vector.load %arg5[%c0_11, %c0_12] : memref<16x128xf32, #tpu.memory_space<vmem>>, vector<16x128xf32>
      tpu.vector_store %arg5[%c0_11, %c0_12], %25 {strides = array<i32>} : memref<16x128xf32, #tpu.memory_space<vmem>>, vector<16x128xf32>,
      %c0_13 = arith.constant 0 : index
      %c0_14 = arith.constant 0 : index
      %27 = vector.load %arg6[%c0_13, %c0_14] : memref<16x128xf32, #tpu.memory_space<vmem>>, vector<16x128xf32>
      %cst_15 = arith.constant 0xFF800000 : f32
      %28 = vector.broadcast %cst_15 : f32 to vector<16x128xf32>
      %29 = arith.select %21, %3, %28 : vector<16x128xi1>, vector<16x128xf32>
      %30 = arith.maximumf %27, %29 : vector<16x128xf32>
      %c0_16 = arith.constant 0 : index
      %c0_17 = arith.constant 0 : index
      %31 = vector.load %arg6[%c0_16, %c0_17] : memref<16x128xf32, #tpu.memory_space<vmem>>, vector<16x128xf32>
      tpu.vector_store %arg6[%c0_16, %c0_17], %30 {strides = array<i32>} : memref<16x128xf32, #tpu.memory_space<vmem>>, vector<16x128xf32>,
    } else {
    }
    %c0_i32_6 = arith.constant 0 : i32
    %14 = arith.cmpi eq, %arg1, %c0_i32_6 : i32
    %15 = arith.extui %14 : i1 to i32
    %c0_i32_7 = arith.constant 0 : i32
    %16 = arith.cmpi ne, %15, %c0_i32_7 : i32
    scf.if %16 {
      %c0_8 = arith.constant 0 : index
      %c0_9 = arith.constant 0 : index
      %17 = vector.load %arg5[%c0_8, %c0_9] : memref<16x128xf32, #tpu.memory_space<vmem>>, vector<16x128xf32>
      %18 = vector.shape_cast %17 : vector<16x128xf32> to vector<1x16x128xf32>
      %cst = arith.constant dense<0x7F800000> : vector<1xf32>
      %19 = vector.multi_reduction <minimumf>, %18, %cst [1, 2] : vector<1x16x128xf32> to vector<1xf32>
      %20 = vector.shape_cast %19 : vector<1xf32> to vector<1x1x1xf32>
      %21 = vector.extract %20[0, 0, 0] : f32 from vector<1x1x1xf32>
      %22 = vector.broadcast %21 : f32 to vector<8x128xf32>
      %c0_10 = arith.constant 0 : index
      %c0_11 = arith.constant 0 : index
      %23 = vector.load %arg3[%c0_10, %c0_11] : memref<8x128xf32, #tpu.memory_space<vmem>>, vector<8x128xf32>
      tpu.vector_store %arg3[%c0_10, %c0_11], %22 {strides = array<i32>} : memref<8x128xf32, #tpu.memory_space<vmem>>, vector<8x128xf32>,
      %c0_12 = arith.constant 0 : index
      %c0_13 = arith.constant 0 : index
      %24 = vector.load %arg6[%c0_12, %c0_13] : memref<16x128xf32, #tpu.memory_space<vmem>>, vector<16x128xf32>
      %25 = vector.shape_cast %24 : vector<16x128xf32> to vector<1x16x128xf32>
      %cst_14 = arith.constant dense<0xFF800000> : vector<1xf32>
      %26 = vector.multi_reduction <maximumf>, %25, %cst_14 [1, 2] : vector<1x16x128xf32> to vector<1xf32>
      %27 = vector.shape_cast %26 : vector<1xf32> to vector<1x1x1xf32>
      %28 = vector.extract %27[0, 0, 0] : f32 from vector<1x1x1xf32>
      %29 = vector.broadcast %28 : f32 to vector<8x128xf32>
      %c0_15 = arith.constant 0 : index
      %c0_16 = arith.constant 0 : index
      %30 = vector.load %arg4[%c0_15, %c0_16] : memref<8x128xf32, #tpu.memory_space<vmem>>, vector<8x128xf32>
      tpu.vector_store %arg4[%c0_15, %c0_16], %29 {strides = array<i32>} : memref<8x128xf32, #tpu.memory_space<vmem>>, vector<8x128xf32>,
    } else {
    }
    return
  }
  func.func @transform_0(%arg0: i32, %arg1: i32) -> (i32, i32) {
    %c1_i32 = arith.constant 1 : i32
    %0 = arith.muli %arg0, %c1_i32 : i32
    %1 = arith.addi %0, %arg1 : i32
    %c0_i32 = arith.constant 0 : i32
    %2 = arith.minsi %1, %c0_i32 : i32
    %c0_i32_0 = arith.constant 0 : i32
    %c0_i32_1 = arith.constant 0 : i32
    return %2, %c0_i32_0 : i32, i32
  }
  func.func @transform_1(%arg0: i32, %arg1: i32) -> (i32, i32) {
    %c0_i32 = arith.constant 0 : i32
    %c0_i32_0 = arith.constant 0 : i32
    return %arg0, %c0_i32 : i32, i32
  }
  func.func @transform_2(%arg0: i32, %arg1: i32) -> (i32, i32) {
    %c0_i32 = arith.constant 0 : i32
    %c0_i32_0 = arith.constant 0 : i32
    return %arg0, %c0_i32 : i32, i32
  }
}

</mosaic_0001>

<bundles_post_ra>
// kernel: pallas_minmax.1
= control target key start
LH: loop header
LB: loop body
LE: loop exit
PB: predicated region body
PF: predicated region fallthrough
CT: control target
= control target key end

     0   :  { %s175_s0 = inlined_call_operand.vmem [shape: f32[16,128], index: 0, kind: input, shape index: {}]   ;;  %s176_s1 = inlined_call_operand.vmem [shape: f32[8,128], index: 1, kind: output, shape index: {0}]   ;;  %s177_s2 = inlined_call_operand.vmem [shape: f32[8,128], index: 2, kind: output, shape index: {1}]  }
   0x1   :  { %v50_v0 = vld [vmem:[%s175_s0] sm:$0xff]  ;;  %v51_v1 = vld [vmem:[%s175_s0 + $0x8] sm:$0xff] }
   0x2   :  { %v104_v2 = vmin.f32 %v50_v0, %v51_v1  ;;  %v118_v3 = vmax.f32 %v50_v0, %v51_v1 }
   0x4   :  { %105 = vmin.xlane.f32.xlu0 %v104_v2 }
   0x8   :  { %119 = vmax.xlane.f32.xlu0 %v118_v3 }
  0x8d   :  { %v106_v4 = vpop.xlane.xlu0 %105 }
  0x8e   :  { %v107_v5 = vrot.slane %v106_v4, 4 }
  0x90   :  { %v108_v6 = vmin.f32 %v106_v4, %v107_v5 }
  0x91   :  { %v120_v7 = vpop.xlane.xlu0 %119 }
  0x92   :  { %v109_v8 = vrot.slane %v108_v6, 2  ;;  %v121_v9 = vrot.slane %v120_v7, 4 }
  0x94   :  { %v122_v10 = vmax.f32 %v120_v7, %v121_v9  ;;  %v110_v11 = vmin.f32 %v108_v6, %v109_v8 }
  0x96   :  { %v123_v12 = vrot.slane %v122_v10, 2  ;;  %v111_v13 = vrot.slane %v110_v11, 1 }
  0x98   :  { %v124_v14 = vmax.f32 %v122_v10, %v123_v12  ;;  %v112_v15 = vmin.f32 %v110_v11, %v111_v13 }
  0x9a   :  { %144 = vpush %v112_v15  ;;  %v125_v16 = vrot.slane %v124_v14, 1 }
  0x9c   :  { %v126_v17 = vmax.f32 %v124_v14, %v125_v16 }
  0x9e   :  { %146 = vpush %v126_v17 }
  0xcb   :  { %s145_s0 = spop %144 }
  0xcc   :  { %v114_v18 = vstv %s145_s0 }
  0xcd   :  { %115 = vst [vmem:[%s176_s1] sm:$0xff] %v114_v18 }
  0xcf   :  { %s147_s15 = spop %146 }
  0xd0   :  { %v128_v19 = vstv %s147_s15 }
  0xd1   :  { %129 = vst [vmem:[%s177_s2] sm:$0xff] %v128_v19 }

</bundles_post_ra>
